<compile_context>
chip_gen: v6e
topology: v6e:2x2x1
jax: 0.10.0
libtpu: 0.0.40
codegen_flags: <defaults>
</compile_context>

<pallas_src>
import functools

import jax
import jax.numpy as jnp
from jax import lax
from jax.experimental import pallas as pl
from jax.experimental.pallas import tpu as pltpu


def _smt_kernel(s_ref, w1_ref, b1_ref, w2_ref, b2_ref, w3_ref, b3_ref,
                gamma_ref, beta_ref, *rest, inv_c, eps, groups):
    o_ref = rest[-1]
    seg_ref = rest[0] if groups > 1 else None

    s_in = s_ref[...]              # native dtype (bf16 stays bf16 -> fast MXU path)
    cdt = w1_ref.dtype             # matmul operand dtype (wrapper casts weights once)

    # linear_1 + ReLU   (f32 accumulation on the MXU)
    h = jnp.dot(s_in.astype(cdt), w1_ref[...],
                preferred_element_type=jnp.float32) + b1_ref[...].astype(jnp.float32)
    h = jnp.maximum(h, 0.0)
    # linear_2 + ReLU
    h = jnp.dot(h.astype(cdt), w2_ref[...],
                preferred_element_type=jnp.float32) + b2_ref[...].astype(jnp.float32)
    h = jnp.maximum(h, 0.0)
    # linear_3
    h = jnp.dot(h.astype(cdt), w3_ref[...],
                preferred_element_type=jnp.float32) + b3_ref[...].astype(jnp.float32)

    # residual add (f32)
    h = h + s_in.astype(jnp.float32)

    # LayerNorm over the true channel dim (per packed group when groups > 1)
    if groups == 1:
        mean = jnp.sum(h, axis=-1, keepdims=True) * inv_c
        centered = h - mean
        var = jnp.sum(centered * centered, axis=-1, keepdims=True) * inv_c
    else:
        # segmented reduction: block-diagonal "ones" matrix broadcasts each group's
        # sum back to all lanes of that group.  Both dots are issued from h so they
        # pipeline back-to-back on the MXU; var = E[x^2] - mean^2 (clamped).
        seg = seg_ref[...]
        sums = jnp.dot(h, seg, preferred_element_type=jnp.float32)
        sumsq = jnp.dot(h * h, seg, preferred_element_type=jnp.float32)
        mean = sums * inv_c
        var = jnp.maximum(sumsq * inv_c - mean * mean, 0.0)
        centered = h - mean

    normed = centered * lax.rsqrt(var + eps)
    out = normed * gamma_ref[...].astype(jnp.float32) + beta_ref[...].astype(jnp.float32)
    o_ref[...] = out.astype(o_ref.dtype)


def _round8_up(x):
    return ((x + 7) // 8) * 8


def _tpu_vmem_and_lane_target():
    """Returns (per-core VMEM bytes, lane-packing target).

    256-lane packing for the 256-wide MXUs of v6e/v7x, 128-lane for v5e and
    older; 64 MiB VMEM on v7x, 128 MiB on v5e/v6e when the query fails.
    """
    kind = ""
    try:
        kind = jax.devices()[0].device_kind.lower()
    except Exception:
        pass
    vmem = None
    try:
        vmem = int(pltpu.get_tpu_info().vmem_capacity_bytes)
    except Exception:
        vmem = None
    if not vmem or vmem <= 0:
        vmem = (64 << 20) if ("v7" in kind or "7x" in kind) else (128 << 20)
    old_gen = any(t in kind for t in ("v2", "v3", "v4", "v5"))
    lane_target = 128 if old_gen else 256
    return vmem, lane_target


def _choose_row_tile(n_packed, rt_cap):
    """Row tile: multiple of 8, <= rt_cap (VMEM cap) and, when there is enough
    work, an even >=4-step grid (balanced across v7x's two TensorCores; keeps
    DMA/compute overlap on v5e/v6e).  Only the last block may be partial."""
    rt_cap = max(8, (rt_cap // 8) * 8)
    if n_packed <= 16:
        return max(1, n_packed)                  # one full-extent block
    nb = pl.cdiv(n_packed, rt_cap)               # minimum steps the VMEM cap allows
    nb = max(nb, 4 if n_packed >= 64 else 2)     # prefer >= 4 steps
    if nb % 2:
        nb += 1                                  # even step count (2 TCs on v7x)
    rt = _round8_up(pl.cdiv(n_packed, nb))
    return min(rt, rt_cap)


def structure_module_transition(s, params, *, row_tile=4096, eps=1e-5):
    """s: array of shape (..., c). Returns same shape/dtype."""
    w1, b1, w2, b2, w3, b3, gamma, beta = params
    c = s.shape[-1]
    orig_shape = s.shape
    s2d = s.reshape(-1, c)
    n_rows = s2d.shape[0]

    vmem_total, lane_target = _tpu_vmem_and_lane_target()

    # Native MXU path: cast weights once to the activation compute dtype.
    compute_dtype = jnp.bfloat16 if s.dtype == jnp.bfloat16 else jnp.float32

    # ---- lane packing: make the lane dim a multiple of 128 (256 on v6e/v7x) ----
    if c % 128 == 0:
        groups = 1
    elif c < lane_target and lane_target % c == 0:
        groups = lane_target // c
    elif c < 128 and 128 % c == 0:
        groups = 128 // c
    else:
        groups = 1
        # TODO(synk): for c that neither divides nor is a multiple of 128, pad the
        # channel dim to a multiple of 128 and mask the pad in the LayerNorm stats.

    # Pad at most groups-1 rows so we never fall back to the lane-sparse
    # (masked vst) path; the pad is sliced off the output.
    pad_rows = (-n_rows) % groups
    if pad_rows:
        s2d = jnp.pad(s2d, ((0, pad_rows), (0, 0)))
    n_rows_p = n_rows + pad_rows
    c_lanes = c * groups
    n_packed = n_rows_p // groups
    s_packed = s2d.reshape(n_packed, c_lanes)        # contiguous -> free reshape

    # torch (out, in) weights -> (in, out); replicate block-diagonally when packing.
    eye_w = jnp.eye(groups, dtype=compute_dtype)

    def prep_w(w):
        wt = w.T.astype(compute_dtype)               # cast once, outside the kernel
        return jnp.kron(eye_w, wt) if groups > 1 else wt

    def prep_v(v):
        v32 = v.astype(jnp.float32)
        return (jnp.tile(v32, groups) if groups > 1 else v32).reshape(1, c_lanes)

    w1t, w2t, w3t = prep_w(w1), prep_w(w2), prep_w(w3)
    b1r, b2r, b3r = prep_v(b1), prep_v(b2), prep_v(b3)
    gr, br = prep_v(gamma), prep_v(beta)

    # ---- VMEM accounting & row-tile selection ----
    dsize = jnp.dtype(s.dtype).itemsize
    wsize = jnp.dtype(compute_dtype).itemsize

    # grid-invariant footprint (weights / seg / vectors; default double-buffering)
    fixed_bytes = 2 * (3 * c_lanes * c_lanes * wsize
                       + (c_lanes * c_lanes * 4 if groups > 1 else 0)
                       + 5 * c_lanes * 4)
    # per packed row: double-buffered in/out tiles + ~6 live f32 intermediates
    per_row_bytes = 2 * c_lanes * dsize + 2 * c_lanes * dsize + 6 * c_lanes * 4

    # generation-aware budget: ~48 MiB of v7x's 64 MiB, ~96 MiB of v5e/v6e's 128 MiB
    vmem_budget = (vmem_total * 3) // 4
    rt_cap = max(8, ((vmem_budget - fixed_bytes) // per_row_bytes) // 8 * 8)
    rt = _choose_row_tile(n_packed, min(int(row_tile), rt_cap))

    grid = (pl.cdiv(n_packed, rt),)                  # partial last block is clipped

    row_spec = pl.BlockSpec((rt, c_lanes), lambda i: (i, 0))
    w_spec = pl.BlockSpec((c_lanes, c_lanes), lambda i: (0, 0))
    vec_spec = pl.BlockSpec((1, c_lanes), lambda i: (0, 0))
    # NOTE: constant index_maps -> weights/bias/seg are DMA'd once and stay resident;
    # pipeline_mode=pl.Buffered(1) would free their second buffer but is skipped for
    # lowering portability (negligible at these sizes).

    inputs = [s_packed, w1t, b1r, w2t, b2r, w3t, b3r, gr, br]
    in_specs = [row_spec, w_spec, vec_spec, w_spec, vec_spec, w_spec, vec_spec,
                vec_spec, vec_spec]
    if groups > 1:
        seg = jnp.kron(jnp.eye(groups, dtype=jnp.float32),
                       jnp.ones((c, c), dtype=jnp.float32))
        inputs.append(seg)
        in_specs.append(w_spec)

    est_vmem = fixed_bytes + rt * per_row_bytes + (8 << 20)   # + slack
    vmem_limit = int(min((vmem_total * 7) // 8, max(32 << 20, est_vmem)))

    out = pl.pallas_call(
        functools.partial(_smt_kernel, inv_c=1.0 / c, eps=eps, groups=groups),
        out_shape=jax.ShapeDtypeStruct((n_packed, c_lanes), s.dtype),
        grid_spec=pltpu.PrefetchScalarGridSpec(
            num_scalar_prefetch=0,
            grid=grid,
            in_specs=in_specs,
            out_specs=row_spec),
        compiler_params=pltpu.CompilerParams(
            dimension_semantics=("parallel",),
            vmem_limit_bytes=vmem_limit),
    )(*inputs)

    out = out.reshape(n_rows_p, c)
    if pad_rows:
        out = out[:n_rows]
    return out.reshape(orig_shape)


def init_params(c, key, *, exercise_all_paths=False):
    """Synthetic init mirroring the module's __init__ shapes.

    Default mode matches the module: linear_1/linear_2 'relu' (He-style, here a
    scaled normal draw), linear_3 'final' (zeros), biases zero, gamma=1, beta=0.
    With exercise_all_paths=True every tensor is nonzero so the self-test actually
    validates the matmul chain, the kron packing and the ReLUs (with w3=0 the
    output would collapse to LayerNorm(s)).
    """
    ks = jax.random.split(key, 8)
    std = (2.0 / c) ** 0.5
    w1 = std * jax.random.normal(ks[0], (c, c), dtype=jnp.float32)   # (out, in)
    w2 = std * jax.random.normal(ks[1], (c, c), dtype=jnp.float32)
    if exercise_all_paths:
        w3 = (1.0 / c) ** 0.5 * jax.random.normal(ks[2], (c, c), dtype=jnp.float32)
        b1 = 0.1 * jax.random.normal(ks[3], (c,), dtype=jnp.float32)
        b2 = 0.1 * jax.random.normal(ks[4], (c,), dtype=jnp.float32)
        b3 = 0.1 * jax.random.normal(ks[5], (c,), dtype=jnp.float32)
        gamma = 1.0 + 0.1 * jax.random.normal(ks[6], (c,), dtype=jnp.float32)
        beta = 0.1 * jax.random.normal(ks[7], (c,), dtype=jnp.float32)
    else:
        w3 = jnp.zeros((c, c), jnp.float32)                          # 'final' init
        b1 = jnp.zeros((c,), jnp.float32)
        b2 = jnp.zeros((c,), jnp.float32)
        b3 = jnp.zeros((c,), jnp.float32)
        gamma = jnp.ones((c,), jnp.float32)
        beta = jnp.zeros((c,), jnp.float32)
    return (w1, b1, w2, b2, w3, b3, gamma, beta)


def reference(s, params, eps=1e-5):
    w1, b1, w2, b2, w3, b3, gamma, beta = params
    hi = jax.lax.Precision.HIGHEST        # true-f32 matmuls for a fair comparison
    s0 = s
    h = jnp.maximum(jnp.dot(s, w1.T, precision=hi) + b1, 0.0)
    h = jnp.maximum(jnp.dot(h, w2.T, precision=hi) + b2, 0.0)
    h = jnp.dot(h, w3.T, precision=hi) + b3
    h = h + s0
    mean = jnp.mean(h, axis=-1, keepdims=True)
    var = jnp.mean((h - mean) ** 2, axis=-1, keepdims=True)
    return (h - mean) / jnp.sqrt(var + eps) * gamma + beta


if __name__ == "__main__":
    key = jax.random.PRNGKey(0)
    c = 32
    batch, seq = 2, 9   # 18 rows: exercises the (<= groups-1)-row padding path
    k_in, k_p = jax.random.split(key)
    s = jax.random.normal(k_in, (batch, seq, c), dtype=jnp.float32)
    params = init_params(c, k_p, exercise_all_paths=True)

    out = structure_module_transition(s, params)
    out = jax.block_until_ready(out)

    ref = reference(s, params)
    assert out.shape == s.shape and out.dtype == s.dtype
    assert jnp.allclose(out, ref, atol=2e-4, rtol=2e-4), "mismatch vs reference"
    print("KERNEL_OK")
</pallas_src>

<mosaic_0001>
module attributes {stable_mosaic.version = 11 : i64} {
  func.func @_smt_kernel(%arg0: i32, %arg1: memref<3x256xf32, #tpu.memory_space<vmem>>, %arg2: memref<256x256xf32, #tpu.memory_space<vmem>>, %arg3: memref<1x256xf32, #tpu.memory_space<vmem>>, %arg4: memref<256x256xf32, #tpu.memory_space<vmem>>, %arg5: memref<1x256xf32, #tpu.memory_space<vmem>>, %arg6: memref<256x256xf32, #tpu.memory_space<vmem>>, %arg7: memref<1x256xf32, #tpu.memory_space<vmem>>, %arg8: memref<1x256xf32, #tpu.memory_space<vmem>>, %arg9: memref<1x256xf32, #tpu.memory_space<vmem>>, %arg10: memref<256x256xf32, #tpu.memory_space<vmem>>, %arg11: memref<3x256xf32, #tpu.memory_space<vmem>>) attributes {dimension_semantics = [#tpu.dimension_semantics<parallel>], iteration_bounds = array<i64: 1>, scalar_prefetch = 0 : i64, scratch_operands = 0 : i64, tpu.core_type = #tpu.core_type<tc>, window_params = [{transform_indices = @transform_0, window_bounds = array<i64: 3, 256>}, {pipeline_mode = #tpu.pipeline_mode<synchronous>, transform_indices = @transform_1, window_bounds = array<i64: 256, 256>}, {pipeline_mode = #tpu.pipeline_mode<synchronous>, transform_indices = @transform_2, window_bounds = array<i64: 1, 256>}, {pipeline_mode = #tpu.pipeline_mode<synchronous>, transform_indices = @transform_3, window_bounds = array<i64: 256, 256>}, {pipeline_mode = #tpu.pipeline_mode<synchronous>, transform_indices = @transform_4, window_bounds = array<i64: 1, 256>}, {pipeline_mode = #tpu.pipeline_mode<synchronous>, transform_indices = @transform_5, window_bounds = array<i64: 256, 256>}, {pipeline_mode = #tpu.pipeline_mode<synchronous>, transform_indices = @transform_6, window_bounds = array<i64: 1, 256>}, {pipeline_mode = #tpu.pipeline_mode<synchronous>, transform_indices = @transform_7, window_bounds = array<i64: 1, 256>}, {pipeline_mode = #tpu.pipeline_mode<synchronous>, transform_indices = @transform_8, window_bounds = array<i64: 1, 256>}, {pipeline_mode = #tpu.pipeline_mode<synchronous>, transform_indices = @transform_9, window_bounds = array<i64: 256, 256>}, {transform_indices = @transform_10, window_bounds = array<i64: 3, 256>}]} {
    %c0 = arith.constant 0 : index
    %c0_0 = arith.constant 0 : index
    %0 = vector.load %arg1[%c0, %c0_0] : memref<3x256xf32, #tpu.memory_space<vmem>>, vector<3x256xf32>
    %c0_1 = arith.constant 0 : index
    %c0_2 = arith.constant 0 : index
    %1 = vector.load %arg2[%c0_1, %c0_2] : memref<256x256xf32, #tpu.memory_space<vmem>>, vector<256x256xf32>
    %cst = arith.constant dense<0.000000e+00> : vector<3x256xf32>
    %2 = tpu.matmul %0, %1, %cst {dimension_numbers = #tpu.dot_dimension_numbers<[1], [0], [0], [1], [0, 0, 1, 1], [], []>} : vector<3x256xf32>, vector<256x256xf32>, vector<3x256xf32> -> vector<3x256xf32>
    %c0_3 = arith.constant 0 : index
    %c0_4 = arith.constant 0 : index
    %3 = vector.load %arg3[%c0_3, %c0_4] : memref<1x256xf32, #tpu.memory_space<vmem>>, vector<1x256xf32>
    %4 = vector.broadcast %3 : vector<1x256xf32> to vector<3x256xf32>
    %5 = arith.addf %2, %4 : vector<3x256xf32>
    %cst_5 = arith.constant 0.000000e+00 : f32
    %6 = vector.broadcast %cst_5 : f32 to vector<3x256xf32>
    %7 = arith.maximumf %5, %6 : vector<3x256xf32>
    %c0_6 = arith.constant 0 : index
    %c0_7 = arith.constant 0 : index
    %8 = vector.load %arg4[%c0_6, %c0_7] : memref<256x256xf32, #tpu.memory_space<vmem>>, vector<256x256xf32>
    %cst_8 = arith.constant dense<0.000000e+00> : vector<3x256xf32>
    %9 = tpu.matmul %7, %8, %cst_8 {dimension_numbers = #tpu.dot_dimension_numbers<[1], [0], [0], [1], [0, 0, 1, 1], [], []>} : vector<3x256xf32>, vector<256x256xf32>, vector<3x256xf32> -> vector<3x256xf32>
    %c0_9 = arith.constant 0 : index
    %c0_10 = arith.constant 0 : index
    %10 = vector.load %arg5[%c0_9, %c0_10] : memref<1x256xf32, #tpu.memory_space<vmem>>, vector<1x256xf32>
    %11 = vector.broadcast %10 : vector<1x256xf32> to vector<3x256xf32>
    %12 = arith.addf %9, %11 : vector<3x256xf32>
    %cst_11 = arith.constant 0.000000e+00 : f32
    %13 = vector.broadcast %cst_11 : f32 to vector<3x256xf32>
    %14 = arith.maximumf %12, %13 : vector<3x256xf32>
    %c0_12 = arith.constant 0 : index
    %c0_13 = arith.constant 0 : index
    %15 = vector.load %arg6[%c0_12, %c0_13] : memref<256x256xf32, #tpu.memory_space<vmem>>, vector<256x256xf32>
    %cst_14 = arith.constant dense<0.000000e+00> : vector<3x256xf32>
    %16 = tpu.matmul %14, %15, %cst_14 {dimension_numbers = #tpu.dot_dimension_numbers<[1], [0], [0], [1], [0, 0, 1, 1], [], []>} : vector<3x256xf32>, vector<256x256xf32>, vector<3x256xf32> -> vector<3x256xf32>
    %c0_15 = arith.constant 0 : index
    %c0_16 = arith.constant 0 : index
    %17 = vector.load %arg7[%c0_15, %c0_16] : memref<1x256xf32, #tpu.memory_space<vmem>>, vector<1x256xf32>
    %18 = vector.broadcast %17 : vector<1x256xf32> to vector<3x256xf32>
    %19 = arith.addf %16, %18 : vector<3x256xf32>
    %20 = arith.addf %19, %0 : vector<3x256xf32>
    %c0_17 = arith.constant 0 : index
    %c0_18 = arith.constant 0 : index
    %21 = vector.load %arg10[%c0_17, %c0_18] : memref<256x256xf32, #tpu.memory_space<vmem>>, vector<256x256xf32>
    %cst_19 = arith.constant dense<0.000000e+00> : vector<3x256xf32>
    %22 = tpu.matmul %20, %21, %cst_19 {dimension_numbers = #tpu.dot_dimension_numbers<[1], [0], [0], [1], [0, 0, 1, 1], [], []>} : vector<3x256xf32>, vector<256x256xf32>, vector<3x256xf32> -> vector<3x256xf32>
    %23 = arith.mulf %20, %20 : vector<3x256xf32>
    %cst_20 = arith.constant dense<0.000000e+00> : vector<3x256xf32>
    %24 = tpu.matmul %23, %21, %cst_20 {dimension_numbers = #tpu.dot_dimension_numbers<[1], [0], [0], [1], [0, 0, 1, 1], [], []>} : vector<3x256xf32>, vector<256x256xf32>, vector<3x256xf32> -> vector<3x256xf32>
    %cst_21 = arith.constant 3.125000e-02 : f32
    %25 = vector.broadcast %cst_21 : f32 to vector<3x256xf32>
    %26 = arith.mulf %22, %25 : vector<3x256xf32>
    %cst_22 = arith.constant 3.125000e-02 : f32
    %27 = vector.broadcast %cst_22 : f32 to vector<3x256xf32>
    %28 = arith.mulf %24, %27 : vector<3x256xf32>
    %29 = arith.mulf %26, %26 : vector<3x256xf32>
    %30 = arith.subf %28, %29 : vector<3x256xf32>
    %cst_23 = arith.constant 0.000000e+00 : f32
    %31 = vector.broadcast %cst_23 : f32 to vector<3x256xf32>
    %32 = arith.maximumf %30, %31 : vector<3x256xf32>
    %33 = arith.subf %20, %26 : vector<3x256xf32>
    %cst_24 = arith.constant 9.99999974E-6 : f32
    %34 = vector.broadcast %cst_24 : f32 to vector<3x256xf32>
    %35 = arith.addf %32, %34 : vector<3x256xf32>
    %36 = math.rsqrt %35 : vector<3x256xf32>
    %37 = arith.mulf %33, %36 : vector<3x256xf32>
    %c0_25 = arith.constant 0 : index
    %c0_26 = arith.constant 0 : index
    %38 = vector.load %arg8[%c0_25, %c0_26] : memref<1x256xf32, #tpu.memory_space<vmem>>, vector<1x256xf32>
    %39 = vector.broadcast %38 : vector<1x256xf32> to vector<3x256xf32>
    %40 = arith.mulf %37, %39 : vector<3x256xf32>
    %c0_27 = arith.constant 0 : index
    %c0_28 = arith.constant 0 : index
    %41 = vector.load %arg9[%c0_27, %c0_28] : memref<1x256xf32, #tpu.memory_space<vmem>>, vector<1x256xf32>
    %42 = vector.broadcast %41 : vector<1x256xf32> to vector<3x256xf32>
    %43 = arith.addf %40, %42 : vector<3x256xf32>
    %c0_29 = arith.constant 0 : index
    %c0_30 = arith.constant 0 : index
    %44 = vector.load %arg11[%c0_29, %c0_30] : memref<3x256xf32, #tpu.memory_space<vmem>>, vector<3x256xf32>
    tpu.vector_store %arg11[%c0_29, %c0_30], %43 {strides = array<i32>} : memref<3x256xf32, #tpu.memory_space<vmem>>, vector<3x256xf32>,
    return
  }
  func.func @transform_0(%arg0: i32) -> (i32, i32) {
    %c0_i32 = arith.constant 0 : i32
    %c0_i32_0 = arith.constant 0 : i32
    return %arg0, %c0_i32 : i32, i32
  }
  func.func @transform_1(%arg0: i32) -> (i32, i32) {
    %c0_i32 = arith.constant 0 : i32
    %c0_i32_0 = arith.constant 0 : i32
    %c0_i32_1 = arith.constant 0 : i32
    return %c0_i32, %c0_i32_0 : i32, i32
  }
  func.func @transform_2(%arg0: i32) -> (i32, i32) {
    %c0_i32 = arith.constant 0 : i32
    %c0_i32_0 = arith.constant 0 : i32
    %c0_i32_1 = arith.constant 0 : i32
    return %c0_i32, %c0_i32_0 : i32, i32
  }
  func.func @transform_3(%arg0: i32) -> (i32, i32) {
    %c0_i32 = arith.constant 0 : i32
    %c0_i32_0 = arith.constant 0 : i32
    %c0_i32_1 = arith.constant 0 : i32
    return %c0_i32, %c0_i32_0 : i32, i32
  }
  func.func @transform_4(%arg0: i32) -> (i32, i32) {
    %c0_i32 = arith.constant 0 : i32
    %c0_i32_0 = arith.constant 0 : i32
    %c0_i32_1 = arith.constant 0 : i32
    return %c0_i32, %c0_i32_0 : i32, i32
  }
  func.func @transform_5(%arg0: i32) -> (i32, i32) {
    %c0_i32 = arith.constant 0 : i32
    %c0_i32_0 = arith.constant 0 : i32
    %c0_i32_1 = arith.constant 0 : i32
    return %c0_i32, %c0_i32_0 : i32, i32
  }
  func.func @transform_6(%arg0: i32) -> (i32, i32) {
    %c0_i32 = arith.constant 0 : i32
    %c0_i32_0 = arith.constant 0 : i32
    %c0_i32_1 = arith.constant 0 : i32
    return %c0_i32, %c0_i32_0 : i32, i32
  }
  func.func @transform_7(%arg0: i32) -> (i32, i32) {
    %c0_i32 = arith.constant 0 : i32
    %c0_i32_0 = arith.constant 0 : i32
    %c0_i32_1 = arith.constant 0 : i32
    return %c0_i32, %c0_i32_0 : i32, i32
  }
  func.func @transform_8(%arg0: i32) -> (i32, i32) {
    %c0_i32 = arith.constant 0 : i32
    %c0_i32_0 = arith.constant 0 : i32
    %c0_i32_1 = arith.constant 0 : i32
    return %c0_i32, %c0_i32_0 : i32, i32
  }
  func.func @transform_9(%arg0: i32) -> (i32, i32) {
    %c0_i32 = arith.constant 0 : i32
    %c0_i32_0 = arith.constant 0 : i32
    %c0_i32_1 = arith.constant 0 : i32
    return %c0_i32, %c0_i32_0 : i32, i32
  }
  func.func @transform_10(%arg0: i32) -> (i32, i32) {
    %c0_i32 = arith.constant 0 : i32
    %c0_i32_0 = arith.constant 0 : i32
    return %arg0, %c0_i32 : i32, i32
  }
}

</mosaic_0001>

<bundles_post_ra>
// kernel: tpu_custom_call.1
= control target key start
LH: loop header
LB: loop body
LE: loop exit
PB: predicated region body
PF: predicated region fallthrough
CT: control target
= control target key end

     0   :  { %15 = vsyncpa [#allocation3], 0  ;;  %s1322_s0 = inlined_call_operand.hbm [shape: f32[3,256], index: 0, kind: input, shape index: {}]   ;;  %s1323_s1 = inlined_call_operand.hbm [shape: f32[256,256], index: 1, kind: input, shape index: {}]   ;;  %s1324_s2 = inlined_call_operand.vmem [shape: f32[1,256], index: 2, kind: input, shape index: {}]   ;;  %s1325_s3 = inlined_call_operand.hbm [shape: f32[256,256], index: 3, kind: input, shape index: {}]   ;;  %s1326_s4 = inlined_call_operand.vmem [shape: f32[1,256], index: 4, kind: input, shape index: {}]   ;;  %s1327_s5 = inlined_call_operand.hbm [shape: f32[256,256], index: 5, kind: input, shape index: {}]   ;;  %s1328_s6 = inlined_call_operand.vmem [shape: f32[1,256], index: 6, kind: input, shape index: {}]   ;;  %s1329_s7 = inlined_call_operand.vmem [shape: f32[1,256], index: 7, kind: input, shape index: {}]   ;;  %s1330_s8 = inlined_call_operand.vmem [shape: f32[1,256], index: 8, kind: input, shape index: {}]   ;;  %s1331_s9 = inlined_call_operand.hbm [shape: f32[256,256], index: 9, kind: input, shape index: {}]   ;;  %s1332_s10 = inlined_call_operand.hbm [shape: f32[3,256], index: 10, kind: output, shape index: {}]  }
   0x1   :  { %16 = vsyncpa [#allocation6], 0 }
   0x2   :  { %17 = vsyncpa [#allocation9], 0 }
   0x3   :  { %18 = vsyncpa [#allocation4], 0  ;;  %s971_s13 = smov [#allocation5]  }
   0x4   :  { %s34_s14 = sshll.u32 %s971_s13, 4  ;;  %s35_s14 = int_to_ptr.vmem [resolvable:$true] %s34_s14 }
   0x5   :  { %s851_s15 = scalar_lea.vmem %s35_s14, 8192  ;;  %p856_p1 = scmp.lt.s32.totalorder %s35_s14, %s35_s14 }
   0x6   :  { %p852_p0 = scmp.ne.s32.totalorder %s35_s14, %s851_s15  ;;  %p857_p2 = scmp.lt.s32.totalorder %s851_s15, %s851_s15 }
   0x8   :  { %p858_p3 = por %p857_p2, %p856_p1 }
   0xa   :  { %p859_p4 = pnand %p858_p3, %p852_p0 }
   0xc   :  { %862 = shalt.err (!%p859_p4)
}
   0xd   :  { %s972_s16 = smov 256   ;;  %s973_s17 = smov 16  }
   0xe   :  { %40 = dma.hbm_to_vmem [thread:$0]  %s1323_s1, 8192, %s35_s14, [#allocation6], %s972_s16, %s972_s16, %s973_s17  }
   0xf   :  { %s974_s20 = smov [#allocation8]   ;;  %s975_s22 = smov [#allocation2]  }
  0x10   :  { %s62_s21 = sshll.u32 %s974_s20, 4  ;;  %s25_s23 = sshll.u32 %s975_s22, 4  ;;  %s63_s21 = int_to_ptr.vmem [resolvable:$true] %s62_s21  ;;  %s26_s23 = int_to_ptr.vmem [resolvable:$true] %s25_s23 }
  0x11   :  { %s871_s24 = scalar_lea.vmem %s63_s21, 8192  ;;  %p876_p6 = scmp.lt.s32.totalorder %s63_s21, %s63_s21 }
  0x12   :  { %p872_p5 = scmp.ne.s32.totalorder %s63_s21, %s871_s24  ;;  %p877_p7 = scmp.lt.s32.totalorder %s871_s24, %s871_s24 }
  0x14   :  { %p878_p8 = por %p877_p7, %p876_p6 }
  0x16   :  { %p879_p9 = pnand %p878_p8, %p872_p5 }
  0x18   :  { %882 = shalt.err (!%p879_p9)
}
  0x19   :  { %68 = dma.hbm_to_vmem [thread:$0]  %s1327_s5, 8192, %s63_s21, [#allocation9], %s972_s16, %s972_s16, %s973_s17  }
  0x1a   :  { %s891_s1 = scalar_lea.vmem %s26_s23, 128  ;;  %p896_p11 = scmp.lt.s32.totalorder %s26_s23, %s26_s23 }
  0x1b   :  { %p892_p10 = scmp.ne.s32.totalorder %s26_s23, %s891_s1  ;;  %p897_p12 = scmp.lt.s32.totalorder %s891_s1, %s891_s1 }
  0x1d   :  { %p898_p13 = por %p897_p12, %p896_p11 }
  0x1f   :  { %p899_p0 = pnand %p898_p13, %p892_p10 }
  0x21   :  { %902 = shalt.err (!%p899_p0)
}
  0x22   :  { %28 = dma.hbm_to_vmem [thread:$0]  %s1322_s0, 128, %s26_s23, [#allocation3]  }
  0x23   :  { %s976_s29 = smov [#allocation7]   ;;  %s977_s11 = smov [#allocation10]  }
  0x24   :  { %s48_s30 = sshll.u32 %s976_s29, 4  ;;  %s80_s12 = sshll.u32 %s977_s11, 4  ;;  %s49_s30 = int_to_ptr.vmem [resolvable:$true] %s48_s30  ;;  %s81_s12 = int_to_ptr.vmem [resolvable:$true] %s80_s12 }
  0x25   :  { %s911_s13 = scalar_lea.vmem %s49_s30, 8192  ;;  %p916_p2 = scmp.lt.s32.totalorder %s49_s30, %s49_s30 }
  0x26   :  { %p912_p1 = scmp.ne.s32.totalorder %s49_s30, %s911_s13  ;;  %p917_p3 = scmp.lt.s32.totalorder %s911_s13, %s911_s13 }
  0x28   :  { %p918_p4 = por %p917_p3, %p916_p2 }
  0x2a   :  { %p919_p5 = pnand %p918_p4, %p912_p1 }
  0x2c   :  { %922 = shalt.err (!%p919_p5)
}
  0x2d   :  { %54 = dma.hbm_to_vmem [thread:$0]  %s1325_s3, 8192, %s49_s30, [#allocation6], %s972_s16, %s972_s16, %s973_s17  }
  0x2e   :  { %s931_s0 = scalar_lea.vmem %s81_s12, 8192  ;;  %p936_p7 = scmp.lt.s32.totalorder %s81_s12, %s81_s12 }
  0x2f   :  { %p932_p6 = scmp.ne.s32.totalorder %s81_s12, %s931_s0  ;;  %p937_p8 = scmp.lt.s32.totalorder %s931_s0, %s931_s0 }
  0x31   :  { %p938_p9 = por %p937_p8, %p936_p7 }
  0x33   :  { %p939_p10 = pnand %p938_p9, %p932_p6 }
  0x35   :  { %942 = shalt.err (!%p939_p10)
}
  0x36   :  { %86 = dma.hbm_to_vmem [thread:$0]  %s1331_s9, 8192, %s81_s12, [#allocation9], %s972_s16, %s972_s16, %s973_s17  }
  0x37   :  { %963 = dma.done.wait [#allocation3], 128  }
  0x38   :  { %964 = vsyncadd [#allocation3], 4294967168 }
  0x39   :  { %965 = dma.done.wait [#allocation6], 16384  }
  0x3a   :  { %966 = vsyncadd [#allocation6], 4294950912 }
  0x3b   :  { %967 = dma.done.wait [#allocation9], 16384  }
  0x3c   :  { %968 = vsyncadd [#allocation9], 4294950912  ;;  %v134_v0 = vld [vmem:[#allocation5 + $0xf8] sm:$0xff]  ;;  %v133_v1 = vld [vmem:[#allocation5 + $0xf0] sm:$0xff] }
  0x3d   :  { %v132_v2 = vld [vmem:[#allocation5 + $0xe8] sm:$0xff]  ;;  %182 = vmatprep.subr.mxu0 %v134_v0  ;;  %v131_v3 = vld [vmem:[#allocation5 + $0xe0] sm:$0xff]  ;;  %v130_v4 = vld [vmem:[#allocation5 + $0xd8] sm:$0xff] }
  0x3e   :  { %183 = vmatpush1.msra.mxu0 %v133_v1  ;;  %v129_v5 = vld [vmem:[#allocation5 + $0xd0] sm:$0xff]  ;;  %v128_v6 = vld [vmem:[#allocation5 + $0xc8] sm:$0xff]  ;;  %v127_v7 = vld [vmem:[#allocation5 + $0xc0] sm:$0xff] }
  0x3f   :  { %184 = vmatprep.subr.mxu0 %v132_v2  ;;  %v126_v8 = vld [vmem:[#allocation5 + $0xb8] sm:$0xff]  ;;  %v125_v9 = vld [vmem:[#allocation5 + $0xb0] sm:$0xff]  ;;  %v124_v10 = vld [vmem:[#allocation5 + $0xa8] sm:$0xff] }
  0x40   :  { %185 = vmatpush1.msra.mxu0 %v131_v3  ;;  %v123_v11 = vld [vmem:[#allocation5 + $0xa0] sm:$0xff]  ;;  %v122_v12 = vld [vmem:[#allocation5 + $0x98] sm:$0xff]  ;;  %v121_v13 = vld [vmem:[#allocation5 + $0x90] sm:$0xff] }
  0x41   :  { %186 = vmatprep.subr.mxu0 %v130_v4  ;;  %v120_v14 = vld [vmem:[#allocation5 + $0x88] sm:$0xff]  ;;  %v119_v15 = vld [vmem:[#allocation5 + $0x80] sm:$0xff]  ;;  %v118_v16 = vld [vmem:[#allocation5 + $0x78] sm:$0xff] }
  0x42   :  { %187 = vmatpush1.msra.mxu0 %v129_v5  ;;  %v117_v17 = vld [vmem:[#allocation5 + $0x70] sm:$0xff]  ;;  %v116_v18 = vld [vmem:[#allocation5 + $0x68] sm:$0xff]  ;;  %v115_v19 = vld [vmem:[#allocation5 + $0x60] sm:$0xff] }
  0x43   :  { %188 = vmatprep.subr.mxu0 %v128_v6  ;;  %v114_v20 = vld [vmem:[#allocation5 + $0x58] sm:$0xff]  ;;  %v113_v21 = vld [vmem:[#allocation5 + $0x50] sm:$0xff]  ;;  %v112_v22 = vld [vmem:[#allocation5 + $0x48] sm:$0xff] }
  0x44   :  { %189 = vmatpush1.msra.mxu0 %v127_v7  ;;  %v111_v23 = vld [vmem:[#allocation5 + $0x40] sm:$0xff]  ;;  %v1061_v24 = vld [vmem:[#allocation2] sm:$0x77]  ;;  %v285_v28 = vld [vmem:[#allocation7 + $0xf0] sm:$0xff] }
  0x45   :  { %190 = vmatprep.subr.mxu0 %v126_v8  ;;  %v286_v25 = vld [vmem:[#allocation7 + $0xf8] sm:$0xff]  ;;  %v1065_v27 = vcombine.high %v1061_v24, %v1061_v24  ;;  %v284_v29 = vld [vmem:[#allocation7 + $0xe8] sm:$0xff]  ;;  %v109_v30 = vld [vmem:[#allocation5 + $0x30] sm:$0xff] }
  0x46   :  { %191 = vmatpush1.msra.mxu0 %v125_v9  ;;  %v110_v26 = vld [vmem:[#allocation5 + $0x38] sm:$0xff]  ;;  %331 = vmatprep.subr.mxu1 %v286_v25  ;;  %v283_v31 = vld [vmem:[#allocation7 + $0xe0] sm:$0xff]  ;;  %v108_v32 = vld [vmem:[#allocation5 + $0x28] sm:$0xff] }
  0x47   :  { %192 = vmatprep.subr.mxu0 %v124_v10  ;;  %1336 = vst [vmem:[#allocation16_spill] sm:$0xff] %v1065_v27  ;;  %332 = vmatpush1.msra.mxu1 %v285_v28  ;;  %v282_v33 = vld [vmem:[#allocation7 + $0xd8] sm:$0xff]  ;;  %v107_v34 = vld [vmem:[#allocation5 + $0x20] sm:$0xff]  ;;  %v281_v35 = vld [vmem:[#allocation7 + $0xd0] sm:$0xff] }
  0x48   :  { %193 = vmatpush1.msra.mxu0 %v123_v11  ;;  %246 = vmatprep.mubr.f32.mxu0 %v1065_v27  ;;  %v106_v36 = vld [vmem:[#allocation5 + $0x18] sm:$0xff]  ;;  %v280_v37 = vld [vmem:[#allocation7 + $0xc8] sm:$0xff]  ;;  %v105_v38 = vld [vmem:[#allocation5 + $0x10] sm:$0xff] }
  0x49   :  { %194 = vmatprep.subr.mxu0 %v122_v12  ;;  %333 = vmatprep.subr.mxu1 %v284_v29  ;;  %v279_v39 = vld [vmem:[#allocation7 + $0xc0] sm:$0xff]  ;;  %v104_v40 = vld [vmem:[#allocation5 + $0x8] sm:$0xff]  ;;  %v278_v41 = vld [vmem:[#allocation7 + $0xb8] sm:$0xff] }
  0x4a   :  { %195 = vmatpush1.msra.mxu0 %v121_v13  ;;  %334 = vmatpush1.msra.mxu1 %v283_v31  ;;  %v103_v42 = vld [vmem:[#allocation5] sm:$0xff]  ;;  %v277_v43 = vld [vmem:[#allocation7 + $0xb0] sm:$0xff]  ;;  %v166_v44 = vld [vmem:[#allocation5 + $0x1f8] sm:$0xff] }
  0x4b   :  { %196 = vmatprep.subr.mxu0 %v120_v14  ;;  %335 = vmatprep.subr.mxu1 %v282_v33  ;;  %v276_v45 = vld [vmem:[#allocation7 + $0xa8] sm:$0xff]  ;;  %v165_v46 = vld [vmem:[#allocation5 + $0x1f0] sm:$0xff]  ;;  %v275_v47 = vld [vmem:[#allocation7 + $0xa0] sm:$0xff] }
  0x4c   :  { %197 = vmatpush1.msra.mxu0 %v119_v15  ;;  %336 = vmatpush1.msra.mxu1 %v281_v35  ;;  %v164_v48 = vld [vmem:[#allocation5 + $0x1e8] sm:$0xff]  ;;  %v274_v49 = vld [vmem:[#allocation7 + $0x98] sm:$0xff]  ;;  %v163_v50 = vld [vmem:[#allocation5 + $0x1e0] sm:$0xff] }
  0x4d   :  { %198 = vmatprep.subr.mxu0 %v118_v16  ;;  %337 = vmatprep.subr.mxu1 %v280_v37  ;;  %v273_v51 = vld [vmem:[#allocation7 + $0x90] sm:$0xff]  ;;  %v162_v52 = vld [vmem:[#allocation5 + $0x1d8] sm:$0xff]  ;;  %v272_v53 = vld [vmem:[#allocation7 + $0x88] sm:$0xff] }
  0x4e   :  { %199 = vmatpush1.msra.mxu0 %v117_v17  ;;  %338 = vmatpush1.msra.mxu1 %v279_v39  ;;  %v161_v54 = vld [vmem:[#allocation5 + $0x1d0] sm:$0xff]  ;;  %v271_v55 = vld [vmem:[#allocation7 + $0x80] sm:$0xff]  ;;  %v160_v56 = vld [vmem:[#allocation5 + $0x1c8] sm:$0xff] }
  0x4f   :  { %200 = vmatprep.subr.mxu0 %v116_v18  ;;  %339 = vmatprep.subr.mxu1 %v278_v41  ;;  %v270_v57 = vld [vmem:[#allocation7 + $0x78] sm:$0xff]  ;;  %v159_v58 = vld [vmem:[#allocation5 + $0x1c0] sm:$0xff]  ;;  %v269_v59 = vld [vmem:[#allocation7 + $0x70] sm:$0xff] }
  0x50   :  { %201 = vmatpush1.msra.mxu0 %v115_v19  ;;  %340 = vmatpush1.msra.mxu1 %v277_v43  ;;  %v158_v60 = vld [vmem:[#allocation5 + $0x1b8] sm:$0xff]  ;;  %v268_v61 = vld [vmem:[#allocation7 + $0x68] sm:$0xff]  ;;  %v157_v62 = vld [vmem:[#allocation5 + $0x1b0] sm:$0xff] }
  0x51   :  { %202 = vmatprep.subr.mxu0 %v114_v20  ;;  %341 = vmatprep.subr.mxu1 %v276_v45  ;;  %v267_v63 = vld [vmem:[#allocation7 + $0x60] sm:$0xff]  ;;  %v156_v0 = vld [vmem:[#allocation5 + $0x1a8] sm:$0xff]  ;;  %v266_v1 = vld [vmem:[#allocation7 + $0x58] sm:$0xff] }
  0x52   :  { %203 = vmatpush1.msra.mxu0 %v113_v21  ;;  %342 = vmatpush1.msra.mxu1 %v275_v47  ;;  %v155_v2 = vld [vmem:[#allocation5 + $0x1a0] sm:$0xff]  ;;  %v265_v3 = vld [vmem:[#allocation7 + $0x50] sm:$0xff]  ;;  %v154_v4 = vld [vmem:[#allocation5 + $0x198] sm:$0xff] }
  0x53   :  { %204 = vmatprep.subr.mxu0 %v112_v22  ;;  %343 = vmatprep.subr.mxu1 %v274_v49  ;;  %v264_v5 = vld [vmem:[#allocation7 + $0x48] sm:$0xff]  ;;  %v153_v6 = vld [vmem:[#allocation5 + $0x190] sm:$0xff]  ;;  %v263_v7 = vld [vmem:[#allocation7 + $0x40] sm:$0xff] }
  0x54   :  { %205 = vmatpush1.msra.mxu0 %v111_v23  ;;  %344 = vmatpush1.msra.mxu1 %v273_v51  ;;  %v152_v8 = vld [vmem:[#allocation5 + $0x188] sm:$0xff]  ;;  %v262_v9 = vld [vmem:[#allocation7 + $0x38] sm:$0xff]  ;;  %v151_v10 = vld [vmem:[#allocation5 + $0x180] sm:$0xff] }
  0x55   :  { %206 = vmatprep.subr.mxu0 %v110_v26  ;;  %345 = vmatprep.subr.mxu1 %v272_v53  ;;  %v261_v11 = vld [vmem:[#allocation7 + $0x30] sm:$0xff]  ;;  %v150_v12 = vld [vmem:[#allocation5 + $0x178] sm:$0xff]  ;;  %v260_v13 = vld [vmem:[#allocation7 + $0x28] sm:$0xff] }
  0x56   :  { %207 = vmatpush1.msra.mxu0 %v109_v30  ;;  %346 = vmatpush1.msra.mxu1 %v271_v55  ;;  %v149_v14 = vld [vmem:[#allocation5 + $0x170] sm:$0xff]  ;;  %v259_v15 = vld [vmem:[#allocation7 + $0x20] sm:$0xff]  ;;  %v148_v16 = vld [vmem:[#allocation5 + $0x168] sm:$0xff] }
  0x57   :  { %208 = vmatprep.subr.mxu0 %v108_v32  ;;  %347 = vmatprep.subr.mxu1 %v270_v57  ;;  %v258_v17 = vld [vmem:[#allocation7 + $0x18] sm:$0xff]  ;;  %v147_v18 = vld [vmem:[#allocation5 + $0x160] sm:$0xff]  ;;  %v257_v19 = vld [vmem:[#allocation7 + $0x10] sm:$0xff] }
  0x58   :  { %209 = vmatpush1.msra.mxu0 %v107_v34  ;;  %348 = vmatpush1.msra.mxu1 %v269_v59  ;;  %v146_v20 = vld [vmem:[#allocation5 + $0x158] sm:$0xff]  ;;  %v256_v21 = vld [vmem:[#allocation7 + $0x8] sm:$0xff]  ;;  %v145_v22 = vld [vmem:[#allocation5 + $0x150] sm:$0xff] }
  0x59   :  { %210 = vmatprep.subr.mxu0 %v106_v36  ;;  %349 = vmatprep.subr.mxu1 %v268_v61  ;;  %v255_v23 = vld [vmem:[#allocation7] sm:$0xff]  ;;  %v144_v25 = vld [vmem:[#allocation5 + $0x148] sm:$0xff]  ;;  %v318_v26 = vld [vmem:[#allocation7 + $0x1f8] sm:$0xff] }
  0x5a   :  { %211 = vmatpush1.msra.mxu0 %v105_v38  ;;  %350 = vmatpush1.msra.mxu1 %v267_v63  ;;  %v143_v28 = vld [vmem:[#allocation5 + $0x140] sm:$0xff]  ;;  %v317_v29 = vld [vmem:[#allocation7 + $0x1f0] sm:$0xff]  ;;  %v142_v30 = vld [vmem:[#allocation5 + $0x138] sm:$0xff] }
  0x5b   :  { %212 = vmatprep.subr.mxu0 %v104_v40  ;;  %351 = vmatprep.subr.mxu1 %v266_v1  ;;  %v316_v31 = vld [vmem:[#allocation7 + $0x1e8] sm:$0xff]  ;;  %v141_v32 = vld [vmem:[#allocation5 + $0x130] sm:$0xff]  ;;  %v315_v33 = vld [vmem:[#allocation7 + $0x1e0] sm:$0xff] }
  0x5c   :  { %213 = vmatpush1.msra.mxu0 %v103_v42  ;;  %352 = vmatpush1.msra.mxu1 %v265_v3  ;;  %v140_v34 = vld [vmem:[#allocation5 + $0x128] sm:$0xff]  ;;  %v314_v35 = vld [vmem:[#allocation7 + $0x1d8] sm:$0xff]  ;;  %v139_v36 = vld [vmem:[#allocation5 + $0x120] sm:$0xff] }
  0x5d   :  { %214 = vmatprep.subr.mxu0 %v166_v44  ;;  %353 = vmatprep.subr.mxu1 %v264_v5  ;;  %v313_v37 = vld [vmem:[#allocation7 + $0x1d0] sm:$0xff]  ;;  %v138_v38 = vld [vmem:[#allocation5 + $0x118] sm:$0xff]  ;;  %v312_v39 = vld [vmem:[#allocation7 + $0x1c8] sm:$0xff] }
  0x5e   :  { %215 = vmatpush2.msra.mxu0 %v165_v46  ;;  %354 = vmatpush1.msra.mxu1 %v263_v7  ;;  %v137_v40 = vld [vmem:[#allocation5 + $0x110] sm:$0xff]  ;;  %v311_v41 = vld [vmem:[#allocation7 + $0x1c0] sm:$0xff]  ;;  %v136_v42 = vld [vmem:[#allocation5 + $0x108] sm:$0xff] }
  0x5f   :  { %216 = vmatprep.subr.mxu0 %v164_v48  ;;  %355 = vmatprep.subr.mxu1 %v262_v9  ;;  %v310_v43 = vld [vmem:[#allocation7 + $0x1b8] sm:$0xff]  ;;  %v135_v44 = vld [vmem:[#allocation5 + $0x100] sm:$0xff]  ;;  %v309_v45 = vld [vmem:[#allocation7 + $0x1b0] sm:$0xff] }
  0x60   :  { %217 = vmatpush2.msra.mxu0 %v163_v50  ;;  %356 = vmatpush1.msra.mxu1 %v261_v11  ;;  %v308_v46 = vld [vmem:[#allocation7 + $0x1a8] sm:$0xff]  ;;  %v307_v47 = vld [vmem:[#allocation7 + $0x1a0] sm:$0xff]  ;;  %v306_v48 = vld [vmem:[#allocation7 + $0x198] sm:$0xff] }
  0x61   :  { %218 = vmatprep.subr.mxu0 %v162_v52  ;;  %357 = vmatprep.subr.mxu1 %v260_v13  ;;  %v305_v49 = vld [vmem:[#allocation7 + $0x190] sm:$0xff]  ;;  %v304_v50 = vld [vmem:[#allocation7 + $0x188] sm:$0xff]  ;;  %v303_v51 = vld [vmem:[#allocation7 + $0x180] sm:$0xff] }
  0x62   :  { %219 = vmatpush2.msra.mxu0 %v161_v54  ;;  %358 = vmatpush1.msra.mxu1 %v259_v15  ;;  %v302_v52 = vld [vmem:[#allocation7 + $0x178] sm:$0xff]  ;;  %v301_v53 = vld [vmem:[#allocation7 + $0x170] sm:$0xff]  ;;  %v300_v54 = vld [vmem:[#allocation7 + $0x168] sm:$0xff] }
  0x63   :  { %220 = vmatprep.subr.mxu0 %v160_v56  ;;  %359 = vmatprep.subr.mxu1 %v258_v17  ;;  %v299_v55 = vld [vmem:[#allocation7 + $0x160] sm:$0xff]  ;;  %v298_v56 = vld [vmem:[#allocation7 + $0x158] sm:$0xff]  ;;  %v297_v57 = vld [vmem:[#allocation7 + $0x150] sm:$0xff] }
  0x64   :  { %221 = vmatpush2.msra.mxu0 %v159_v58  ;;  %360 = vmatpush1.msra.mxu1 %v257_v19  ;;  %v295_v58 = vld [vmem:[#allocation7 + $0x140] sm:$0xff]  ;;  %v294_v59 = vld [vmem:[#allocation7 + $0x138] sm:$0xff]  ;;  %v292_v61 = vld [vmem:[#allocation7 + $0x128] sm:$0xff] }
  0x65   :  { %222 = vmatprep.subr.mxu0 %v158_v60  ;;  %361 = vmatprep.subr.mxu1 %v256_v21  ;;  %v293_v60 = vld [vmem:[#allocation7 + $0x130] sm:$0xff]  ;;  %v290_v63 = vld [vmem:[#allocation7 + $0x118] sm:$0xff]  ;;  %v288_v1 = vld [vmem:[#allocation7 + $0x108] sm:$0xff] }
  0x66   :  { %223 = vmatpush2.msra.mxu0 %v157_v62  ;;  %362 = vmatpush1.msra.mxu1 %v255_v23  ;;  %v291_v62 = vld [vmem:[#allocation7 + $0x120] sm:$0xff]  ;;  %v435_v3 = vld [vmem:[#allocation8 + $0xf8] sm:$0xff]  ;;  %v433_v5 = vld [vmem:[#allocation8 + $0xe8] sm:$0xff] }
  0x67   :  { %224 = vmatprep.subr.mxu0 %v156_v0  ;;  %363 = vmatprep.subr.mxu1 %v318_v26  ;;  %v289_v0 = vld [vmem:[#allocation7 + $0x110] sm:$0xff]  ;;  %v431_v7 = vld [vmem:[#allocation8 + $0xd8] sm:$0xff]  ;;  %v429_v9 = vld [vmem:[#allocation8 + $0xc8] sm:$0xff] }
  0x68   :  { %225 = vmatpush2.msra.mxu0 %v155_v2  ;;  %364 = vmatpush2.msra.mxu1 %v317_v29  ;;  %v287_v2 = vld [vmem:[#allocation7 + $0x100] sm:$0xff]  ;;  %v427_v11 = vld [vmem:[#allocation8 + $0xb8] sm:$0xff]  ;;  %v425_v13 = vld [vmem:[#allocation8 + $0xa8] sm:$0xff] }
  0x69   :  { %226 = vmatprep.subr.mxu0 %v154_v4  ;;  %365 = vmatprep.subr.mxu1 %v316_v31  ;;  %v434_v4 = vld [vmem:[#allocation8 + $0xf0] sm:$0xff]  ;;  %v423_v15 = vld [vmem:[#allocation8 + $0x98] sm:$0xff]  ;;  %v421_v17 = vld [vmem:[#allocation8 + $0x88] sm:$0xff] }
  0x6a   :  { %227 = vmatpush2.msra.mxu0 %v153_v6  ;;  %366 = vmatpush2.msra.mxu1 %v315_v33  ;;  %v432_v6 = vld [vmem:[#allocation8 + $0xe0] sm:$0xff]  ;;  %v419_v19 = vld [vmem:[#allocation8 + $0x78] sm:$0xff]  ;;  %v417_v21 = vld [vmem:[#allocation8 + $0x68] sm:$0xff] }
  0x6b   :  { %228 = vmatprep.subr.mxu0 %v152_v8  ;;  %367 = vmatprep.subr.mxu1 %v314_v35  ;;  %v430_v8 = vld [vmem:[#allocation8 + $0xd0] sm:$0xff]  ;;  %v415_v23 = vld [vmem:[#allocation8 + $0x58] sm:$0xff]  ;;  %v413_v26 = vld [vmem:[#allocation8 + $0x48] sm:$0xff] }
  0x6c   :  { %229 = vmatpush2.msra.mxu0 %v151_v10  ;;  %368 = vmatpush2.msra.mxu1 %v313_v37  ;;  %v428_v10 = vld [vmem:[#allocation8 + $0xc0] sm:$0xff]  ;;  %v411_v29 = vld [vmem:[#allocation8 + $0x38] sm:$0xff]  ;;  %v409_v31 = vld [vmem:[#allocation8 + $0x28] sm:$0xff] }
  0x6d   :  { %230 = vmatprep.subr.mxu0 %v150_v12  ;;  %369 = vmatprep.subr.mxu1 %v312_v39  ;;  %v426_v12 = vld [vmem:[#allocation8 + $0xb0] sm:$0xff]  ;;  %v407_v33 = vld [vmem:[#allocation8 + $0x18] sm:$0xff]  ;;  %v405_v35 = vld [vmem:[#allocation8 + $0x8] sm:$0xff] }
  0x6e   :  { %231 = vmatpush2.msra.mxu0 %v149_v14  ;;  %370 = vmatpush2.msra.mxu1 %v311_v41  ;;  %v424_v14 = vld [vmem:[#allocation8 + $0xa0] sm:$0xff]  ;;  %v467_v37 = vld [vmem:[#allocation8 + $0x1f8] sm:$0xff]  ;;  %v465_v39 = vld [vmem:[#allocation8 + $0x1e8] sm:$0xff] }
  0x6f   :  { %232 = vmatprep.subr.mxu0 %v148_v16  ;;  %371 = vmatprep.subr.mxu1 %v310_v43  ;;  %v422_v16 = vld [vmem:[#allocation8 + $0x90] sm:$0xff]  ;;  %v463_v41 = vld [vmem:[#allocation8 + $0x1d8] sm:$0xff]  ;;  %v461_v43 = vld [vmem:[#allocation8 + $0x1c8] sm:$0xff] }
  0x70   :  { %233 = vmatpush2.msra.mxu0 %v147_v18  ;;  %372 = vmatpush2.msra.mxu1 %v309_v45  ;;  %v420_v18 = vld [vmem:[#allocation8 + $0x80] sm:$0xff]  ;;  %v459_v45 = vld [vmem:[#allocation8 + $0x1b8] sm:$0xff] }
  0x71   :  { %234 = vmatprep.subr.mxu0 %v146_v20  ;;  %373 = vmatprep.subr.mxu1 %v308_v46  ;;  %v418_v20 = vld [vmem:[#allocation8 + $0x70] sm:$0xff] }
  0x72   :  { %235 = vmatpush2.msra.mxu0 %v145_v22  ;;  %374 = vmatpush2.msra.mxu1 %v307_v47  ;;  %v416_v22 = vld [vmem:[#allocation8 + $0x60] sm:$0xff]  ;;  %v458_v46 = vld [vmem:[#allocation8 + $0x1b0] sm:$0xff]  ;;  %v457_v47 = vld [vmem:[#allocation8 + $0x1a8] sm:$0xff] }
  0x73   :  { %236 = vmatprep.subr.mxu0 %v144_v25  ;;  %375 = vmatprep.subr.mxu1 %v306_v48  ;;  %v414_v25 = vld [vmem:[#allocation8 + $0x50] sm:$0xff]  ;;  %v456_v48 = vld [vmem:[#allocation8 + $0x1a0] sm:$0xff] }
  0x74   :  { %237 = vmatpush2.msra.mxu0 %v143_v28  ;;  %376 = vmatpush2.msra.mxu1 %v305_v49  ;;  %v412_v28 = vld [vmem:[#allocation8 + $0x40] sm:$0xff]  ;;  %v455_v49 = vld [vmem:[#allocation8 + $0x198] sm:$0xff] }
  0x75   :  { %238 = vmatprep.subr.mxu0 %v142_v30  ;;  %377 = vmatprep.subr.mxu1 %v304_v50  ;;  %v410_v30 = vld [vmem:[#allocation8 + $0x30] sm:$0xff] }
  0x76   :  { %239 = vmatpush2.msra.mxu0 %v141_v32  ;;  %378 = vmatpush2.msra.mxu1 %v303_v51  ;;  %v408_v32 = vld [vmem:[#allocation8 + $0x20] sm:$0xff]  ;;  %v454_v50 = vld [vmem:[#allocation8 + $0x190] sm:$0xff]  ;;  %v453_v51 = vld [vmem:[#allocation8 + $0x188] sm:$0xff] }
  0x77   :  { %240 = vmatprep.subr.mxu0 %v140_v34  ;;  %379 = vmatprep.subr.mxu1 %v302_v52  ;;  %v406_v34 = vld [vmem:[#allocation8 + $0x10] sm:$0xff]  ;;  %v452_v52 = vld [vmem:[#allocation8 + $0x180] sm:$0xff] }
  0x78   :  { %241 = vmatpush2.msra.mxu0 %v139_v36  ;;  %380 = vmatpush2.msra.mxu1 %v301_v53  ;;  %v404_v36 = vld [vmem:[#allocation8] sm:$0xff]  ;;  %v451_v53 = vld [vmem:[#allocation8 + $0x178] sm:$0xff] }
  0x79   :  { %242 = vmatprep.subr.mxu0 %v138_v38  ;;  %381 = vmatprep.subr.mxu1 %v300_v54  ;;  %v466_v38 = vld [vmem:[#allocation8 + $0x1f0] sm:$0xff] }
  0x7a   :  { %243 = vmatpush2.msra.mxu0 %v137_v40  ;;  %382 = vmatpush2.msra.mxu1 %v299_v55  ;;  %v464_v40 = vld [vmem:[#allocation8 + $0x1e0] sm:$0xff]  ;;  %v450_v54 = vld [vmem:[#allocation8 + $0x170] sm:$0xff]  ;;  %v449_v55 = vld [vmem:[#allocation8 + $0x168] sm:$0xff] }
  0x7b   :  { %244 = vmatprep.subr.mxu0 %v136_v42  ;;  %383 = vmatprep.subr.mxu1 %v298_v56  ;;  %v462_v42 = vld [vmem:[#allocation8 + $0x1d0] sm:$0xff]  ;;  %v448_v56 = vld [vmem:[#allocation8 + $0x160] sm:$0xff] }
  0x7c   :  { %245 = vmatpush2.msra.mxu0 %v135_v44  ;;  %384 = vmatpush2.msra.mxu1 %v297_v57  ;;  %v460_v44 = vld [vmem:[#allocation8 + $0x1c0] sm:$0xff]  ;;  %v447_v57 = vld [vmem:[#allocation8 + $0x158] sm:$0xff] }
  0x7d   :  { %247 = vmatmul.mubr.f32.vlgmr.msra.gmra.mxu0 %v1061_v24  ;;  %v296_v24 = vld [vmem:[#allocation7 + $0x148] sm:$0xff]  ;;  %480 = vmatprep.subr.mxu0 %v435_v3 }
  0x7e   :  { %385 = vmatprep.subr.mxu1 %v296_v24  ;;  %481 = vmatpush1.msra.mxu0 %v434_v4  ;;  %v446_v24 = vld [vmem:[#allocation8 + $0x150] sm:$0xff] }
  0x7f   :  { %386 = vmatpush2.msra.mxu1 %v295_v58  ;;  %482 = vmatprep.subr.mxu0 %v433_v5  ;;  %v445_v58 = vld [vmem:[#allocation8 + $0x148] sm:$0xff] }
  0x80   :  { %387 = vmatprep.subr.mxu1 %v294_v59  ;;  %483 = vmatpush1.msra.mxu0 %v432_v6  ;;  %v444_v59 = vld [vmem:[#allocation8 + $0x140] sm:$0xff] }
  0x81   :  { %388 = vmatpush2.msra.mxu1 %v293_v60  ;;  %484 = vmatprep.subr.mxu0 %v431_v7  ;;  %v169_v60 = vlaneseq }
  0x82   :  { %389 = vmatprep.subr.mxu1 %v292_v61  ;;  %485 = vmatpush1.msra.mxu0 %v430_v8 }
  0x83   :  { %390 = vmatpush2.msra.mxu1 %v291_v62  ;;  %486 = vmatprep.subr.mxu0 %v429_v9  ;;  %v170_v61 = vshrl.u32 %v169_v60, 7  ;;  %v443_v9 = vld [vmem:[#allocation8 + $0x138] sm:$0xff]  ;;  %v1199_v60 = vld [vmem:[#allocation10 + $0x1a8] sm:$0xff] }
  0x84   :  { %391 = vmatprep.subr.mxu1 %v290_v63  ;;  %487 = vmatpush1.msra.mxu0 %v428_v10  ;;  %v167_v63 = vld [vmem:[%s1324_s2] sm:$0x3]  ;;  %v442_v10 = vld [vmem:[#allocation8 + $0x130] sm:$0xff] }
  0x85   :  { %392 = vmatpush2.msra.mxu1 %v289_v0  ;;  %488 = vmatprep.subr.mxu0 %v427_v11  ;;  %v1069_v62 = vsub.s32 0, %v170_v61  ;;  %v1074_v0 = vsub.s32 1, %v170_v61  ;;  %v441_v11 = vld [vmem:[#allocation8 + $0x128] sm:$0xff]  ;;  %v1202_v61 = vld [vmem:[#allocation10 + $0x1a0] sm:$0xff] }
  0x86   :  { %393 = vmatprep.subr.mxu1 %v288_v1  ;;  %489 = vmatpush1.msra.mxu0 %v426_v12  ;;  %v440_v12 = vld [vmem:[#allocation8 + $0x120] sm:$0xff] }
  0x87   :  { %394 = vmatpush2.msra.mxu1 %v287_v2  ;;  %490 = vmatprep.subr.mxu0 %v425_v13  ;;  %v172_v1 = vrot.slane %v167_v63, %v1069_v62  ;;  %v176_v2 = vrot.slane %v167_v63, %v1074_v0  ;;  %v439_v13 = vld [vmem:[#allocation8 + $0x118] sm:$0xff] }
  0x88   :  { %491 = vmatpush1.msra.mxu0 %v424_v14  ;;  %v438_v14 = vld [vmem:[#allocation8 + $0x110] sm:$0xff]  ;;  %v1205_v63 = vld [vmem:[#allocation10 + $0x198] sm:$0xff] }
  0x89   :  { %492 = vmatprep.subr.mxu0 %v423_v15  ;;  %v437_v15 = vld [vmem:[#allocation8 + $0x108] sm:$0xff] }
  0x8a   :  { %493 = vmatpush1.msra.mxu0 %v422_v16  ;;  %v436_v16 = vld [vmem:[#allocation8 + $0x100] sm:$0xff] }
  0x8b   :  { %494 = vmatprep.subr.mxu0 %v421_v17  ;;  %v584_v17 = vld [vmem:[#allocation10 + $0xf8] sm:$0xff] }
  0x8c   :  { %495 = vmatpush1.msra.mxu0 %v420_v18  ;;  %v1078_v18 = vld [vmem:[#allocation10 + $0xf0] sm:$0xff]  ;;  %617 = vmatprep.subr.mxu1 %v584_v17 }
  0x8d   :  { %496 = vmatprep.subr.mxu0 %v419_v19  ;;  %v1080_v19 = vld [vmem:[#allocation10 + $0xe8] sm:$0xff] }
  0x8e   :  { %497 = vmatpush1.msra.mxu0 %v418_v20  ;;  %v1082_v20 = vld [vmem:[#allocation10 + $0xe0] sm:$0xff] }
  0x8f   :  { %498 = vmatprep.subr.mxu0 %v417_v21  ;;  %v1085_v21 = vld [vmem:[#allocation10 + $0xd8] sm:$0xff] }
  0x90   :  { %499 = vmatpush1.msra.mxu0 %v416_v22  ;;  %v1088_v22 = vld [vmem:[#allocation10 + $0xd0] sm:$0xff] }
  0x91   :  { %500 = vmatprep.subr.mxu0 %v415_v23  ;;  %v1091_v23 = vld [vmem:[#allocation10 + $0xc8] sm:$0xff] }
  0x92   :  { %501 = vmatpush1.msra.mxu0 %v414_v25  ;;  %v1094_v25 = vld [vmem:[#allocation10 + $0xc0] sm:$0xff] }
  0x93   :  { %502 = vmatprep.subr.mxu0 %v413_v26  ;;  %v1097_v26 = vld [vmem:[#allocation10 + $0xb8] sm:$0xff] }
  0x94   :  { %503 = vmatpush1.msra.mxu0 %v412_v28  ;;  %v1100_v28 = vld [vmem:[#allocation10 + $0xb0] sm:$0xff] }
  0x95   :  { %504 = vmatprep.subr.mxu0 %v411_v29  ;;  %v1103_v29 = vld [vmem:[#allocation10 + $0xa8] sm:$0xff] }
  0x96   :  { %505 = vmatpush1.msra.mxu0 %v410_v30  ;;  %v1106_v30 = vld [vmem:[#allocation10 + $0xa0] sm:$0xff] }
  0x97   :  { %506 = vmatprep.subr.mxu0 %v409_v31  ;;  %v1109_v31 = vld [vmem:[#allocation10 + $0x98] sm:$0xff] }
  0x98   :  { %507 = vmatpush1.msra.mxu0 %v408_v32  ;;  %v1112_v32 = vld [vmem:[#allocation10 + $0x90] sm:$0xff] }
  0x99   :  { %508 = vmatprep.subr.mxu0 %v407_v33  ;;  %v1115_v33 = vld [vmem:[#allocation10 + $0x88] sm:$0xff] }
  0x9a   :  { %509 = vmatpush1.msra.mxu0 %v406_v34  ;;  %v1118_v34 = vld [vmem:[#allocation10 + $0x80] sm:$0xff] }
  0x9b   :  { %510 = vmatprep.subr.mxu0 %v405_v35  ;;  %v1121_v35 = vld [vmem:[#allocation10 + $0x78] sm:$0xff] }
  0x9c   :  { %511 = vmatpush1.msra.mxu0 %v404_v36  ;;  %v1124_v36 = vld [vmem:[#allocation10 + $0x70] sm:$0xff] }
  0x9d   :  { %512 = vmatprep.subr.mxu0 %v467_v37  ;;  %v1127_v37 = vld [vmem:[#allocation10 + $0x68] sm:$0xff] }
  0x9e   :  { %513 = vmatpush2.msra.mxu0 %v466_v38  ;;  %v1130_v38 = vld [vmem:[#allocation10 + $0x60] sm:$0xff] }
  0x9f   :  { %514 = vmatprep.subr.mxu0 %v465_v39  ;;  %v1133_v39 = vld [vmem:[#allocation10 + $0x58] sm:$0xff] }
  0xa0   :  { %515 = vmatpush2.msra.mxu0 %v464_v40  ;;  %v1136_v40 = vld [vmem:[#allocation10 + $0x50] sm:$0xff] }
  0xa1   :  { %516 = vmatprep.subr.mxu0 %v463_v41  ;;  %v1139_v41 = vld [vmem:[#allocation10 + $0x48] sm:$0xff] }
  0xa2   :  { %517 = vmatpush2.msra.mxu0 %v462_v42  ;;  %v1142_v42 = vld [vmem:[#allocation10 + $0x40] sm:$0xff] }
  0xa3   :  { %518 = vmatprep.subr.mxu0 %v461_v43  ;;  %v1145_v43 = vld [vmem:[#allocation10 + $0x38] sm:$0xff] }
  0xa4   :  { %519 = vmatpush2.msra.mxu0 %v460_v44  ;;  %v1148_v44 = vld [vmem:[#allocation10 + $0x30] sm:$0xff] }
  0xa5   :  { %520 = vmatprep.subr.mxu0 %v459_v45  ;;  %v1151_v45 = vld [vmem:[#allocation10 + $0x28] sm:$0xff] }
  0xa6   :  { %521 = vmatpush2.msra.mxu0 %v458_v46  ;;  %v1154_v46 = vld [vmem:[#allocation10 + $0x20] sm:$0xff] }
  0xa7   :  { %522 = vmatprep.subr.mxu0 %v457_v47  ;;  %v1157_v47 = vld [vmem:[#allocation10 + $0x18] sm:$0xff] }
  0xa8   :  { %523 = vmatpush2.msra.mxu0 %v456_v48  ;;  %v1160_v48 = vld [vmem:[#allocation10 + $0x10] sm:$0xff] }
  0xa9   :  { %524 = vmatprep.subr.mxu0 %v455_v49  ;;  %v1163_v49 = vld [vmem:[#allocation10 + $0x8] sm:$0xff] }
  0xaa   :  { %525 = vmatpush2.msra.mxu0 %v454_v50  ;;  %v1166_v50 = vld [vmem:[#allocation10] sm:$0xff] }
  0xab   :  { %526 = vmatprep.subr.mxu0 %v453_v51  ;;  %v1169_v51 = vld [vmem:[#allocation10 + $0x1f8] sm:$0xff] }
  0xac   :  { %527 = vmatpush2.msra.mxu0 %v452_v52  ;;  %v1172_v52 = vld [vmem:[#allocation10 + $0x1f0] sm:$0xff] }
  0xad   :  { %528 = vmatprep.subr.mxu0 %v451_v53  ;;  %v1175_v53 = vld [vmem:[#allocation10 + $0x1e8] sm:$0xff] }
  0xae   :  { %529 = vmatpush2.msra.mxu0 %v450_v54  ;;  %v1178_v54 = vld [vmem:[#allocation10 + $0x1e0] sm:$0xff] }
  0xaf   :  { %530 = vmatprep.subr.mxu0 %v449_v55  ;;  %v1181_v55 = vld [vmem:[#allocation10 + $0x1d8] sm:$0xff] }
  0xb0   :  { %531 = vmatpush2.msra.mxu0 %v448_v56  ;;  %v1184_v56 = vld [vmem:[#allocation10 + $0x1d0] sm:$0xff] }
  0xb1   :  { %532 = vmatprep.subr.mxu0 %v447_v57  ;;  %v1187_v57 = vld [vmem:[#allocation10 + $0x1c8] sm:$0xff] }
  0xb2   :  { %533 = vmatpush2.msra.mxu0 %v446_v24  ;;  %v1190_v24 = vld [vmem:[#allocation10 + $0x1c0] sm:$0xff] }
  0xb3   :  { %534 = vmatprep.subr.mxu0 %v445_v58  ;;  %v1193_v58 = vld [vmem:[#allocation10 + $0x1b8] sm:$0xff] }
  0xb4   :  { %535 = vmatpush2.msra.mxu0 %v444_v59  ;;  %v1196_v59 = vld [vmem:[#allocation10 + $0x1b0] sm:$0xff] }
  0xb5   :  { %536 = vmatprep.subr.mxu0 %v443_v9  ;;  %v1232_v9 = vld [vmem:[#allocation10 + $0x150] sm:$0xff] }
  0xb6   :  { %537 = vmatpush2.msra.mxu0 %v442_v10  ;;  %v1235_v10 = vld [vmem:[#allocation10 + $0x148] sm:$0xff] }
  0xb7   :  { %538 = vmatprep.subr.mxu0 %v441_v11  ;;  %v1238_v11 = vld [vmem:[#allocation10 + $0x140] sm:$0xff] }
  0xb8   :  { %539 = vmatpush2.msra.mxu0 %v440_v12  ;;  %v319_v12 = vld [vmem:[%s1326_s4] sm:$0x3] }
  0xb9   :  { %540 = vmatprep.subr.mxu0 %v439_v13  ;;  %v324_v13 = vrot.slane %v319_v12, %v1069_v62 }
  0xba   :  { %541 = vmatpush2.msra.mxu0 %v438_v14  ;;  %v328_v14 = vrot.slane %v319_v12, %v1074_v0 }
  0xbb   :  { %542 = vmatprep.subr.mxu0 %v437_v15 }
  0xbc   :  { %543 = vmatpush2.msra.mxu0 %v436_v16 }
  0xbd   :  { %690 = vmatprep.subr.mxu0 %v584_v17 }
 0x13d   :  { %v248_v3 = vpop.f32.mrf.mxu0 }
 0x13e   :  { %v249_v4 = vadd.f32 %v248_v3, %v172_v1  ;;  %v1208_v1 = vld [vmem:[#allocation10 + $0x190] sm:$0xff]  ;;  %v1214_v3 = vld [vmem:[#allocation10 + $0x180] sm:$0xff] }
 0x13f   :  { %v250_v5 = vpop.f32.mrf.mxu0 }
 0x140   :  { %v251_v6 = vadd.f32 %v250_v5, %v176_v2  ;;  %v253_v8 = vmax.f32 %v249_v4, 0.0  ;;  %v1211_v2 = vld [vmem:[#allocation10 + $0x188] sm:$0xff]  ;;  %v1217_v4 = vld [vmem:[#allocation10 + $0x178] sm:$0xff]  ;;  %v1220_v5 = vld [vmem:[#allocation10 + $0x170] sm:$0xff] }
 0x142   :  { %v254_v7 = vmax.f32 %v251_v6, 0.0  ;;  %v1223_v6 = vld [vmem:[#allocation10 + $0x168] sm:$0xff] }
 0x144   :  { %395 = vmatprep.mubr.f32.mxu1 %v254_v7  ;;  %v1226_v7 = vld [vmem:[#allocation10 + $0x160] sm:$0xff] }
 0x145   :  { %396 = vmatmul.mubr.f32.vlgmr.msra.gmra.mxu1 %v253_v8  ;;  %1337 = vst [vmem:[#allocation17_spill] sm:$0xff] %v1226_v7  ;;  %v1229_v8 = vld [vmem:[#allocation10 + $0x158] sm:$0xff] }
 0x146   :  { %618 = vmatpush1.msra.mxu1 %v1078_v18  ;;  %1338 = vst [vmem:[#allocation18_spill] sm:$0xff] %v1229_v8 }
 0x147   :  { %619 = vmatprep.subr.mxu1 %v1080_v19 }
 0x148   :  { %620 = vmatpush1.msra.mxu1 %v1082_v20 }
 0x149   :  { %621 = vmatprep.subr.mxu1 %v1085_v21 }
 0x14a   :  { %622 = vmatpush1.msra.mxu1 %v1088_v22 }
 0x14b   :  { %623 = vmatprep.subr.mxu1 %v1091_v23 }
 0x14c   :  { %624 = vmatpush1.msra.mxu1 %v1094_v25 }
 0x14d   :  { %625 = vmatprep.subr.mxu1 %v1097_v26 }
 0x14e   :  { %626 = vmatpush1.msra.mxu1 %v1100_v28 }
 0x14f   :  { %627 = vmatprep.subr.mxu1 %v1103_v29 }
 0x150   :  { %628 = vmatpush1.msra.mxu1 %v1106_v30 }
 0x151   :  { %629 = vmatprep.subr.mxu1 %v1109_v31 }
 0x152   :  { %630 = vmatpush1.msra.mxu1 %v1112_v32 }
 0x153   :  { %631 = vmatprep.subr.mxu1 %v1115_v33 }
 0x154   :  { %632 = vmatpush1.msra.mxu1 %v1118_v34 }
 0x155   :  { %633 = vmatprep.subr.mxu1 %v1121_v35 }
 0x156   :  { %634 = vmatpush1.msra.mxu1 %v1124_v36 }
 0x157   :  { %635 = vmatprep.subr.mxu1 %v1127_v37 }
 0x158   :  { %636 = vmatpush1.msra.mxu1 %v1130_v38 }
 0x159   :  { %637 = vmatprep.subr.mxu1 %v1133_v39 }
 0x15a   :  { %638 = vmatpush1.msra.mxu1 %v1136_v40 }
 0x15b   :  { %639 = vmatprep.subr.mxu1 %v1139_v41 }
 0x15c   :  { %640 = vmatpush1.msra.mxu1 %v1142_v42 }
 0x15d   :  { %641 = vmatprep.subr.mxu1 %v1145_v43 }
 0x15e   :  { %642 = vmatpush1.msra.mxu1 %v1148_v44 }
 0x15f   :  { %643 = vmatprep.subr.mxu1 %v1151_v45 }
 0x160   :  { %644 = vmatpush1.msra.mxu1 %v1154_v46 }
 0x161   :  { %645 = vmatprep.subr.mxu1 %v1157_v47 }
 0x162   :  { %646 = vmatpush1.msra.mxu1 %v1160_v48 }
 0x163   :  { %647 = vmatprep.subr.mxu1 %v1163_v49 }
 0x164   :  { %648 = vmatpush1.msra.mxu1 %v1166_v50 }
 0x165   :  { %649 = vmatprep.subr.mxu1 %v1169_v51 }
 0x166   :  { %650 = vmatpush2.msra.mxu1 %v1172_v52 }
 0x167   :  { %651 = vmatprep.subr.mxu1 %v1175_v53 }
 0x168   :  { %652 = vmatpush2.msra.mxu1 %v1178_v54 }
 0x169   :  { %653 = vmatprep.subr.mxu1 %v1181_v55 }
 0x16a   :  { %654 = vmatpush2.msra.mxu1 %v1184_v56 }
 0x16b   :  { %655 = vmatprep.subr.mxu1 %v1187_v57 }
 0x16c   :  { %656 = vmatpush2.msra.mxu1 %v1190_v24 }
 0x16d   :  { %657 = vmatprep.subr.mxu1 %v1193_v58 }
 0x16e   :  { %658 = vmatpush2.msra.mxu1 %v1196_v59 }
 0x16f   :  { %659 = vmatprep.subr.mxu1 %v1199_v60 }
 0x170   :  { %660 = vmatpush2.msra.mxu1 %v1202_v61 }
 0x171   :  { %661 = vmatprep.subr.mxu1 %v1205_v63 }
 0x172   :  { %662 = vmatpush2.msra.mxu1 %v1208_v1 }
 0x173   :  { %663 = vmatprep.subr.mxu1 %v1211_v2 }
 0x174   :  { %664 = vmatpush2.msra.mxu1 %v1214_v3 }
 0x175   :  { %665 = vmatprep.subr.mxu1 %v1217_v4 }
 0x176   :  { %666 = vmatpush2.msra.mxu1 %v1220_v5 }
 0x177   :  { %667 = vmatprep.subr.mxu1 %v1223_v6 }
 0x178   :  { %668 = vmatpush2.msra.mxu1 %v1226_v7 }
 0x179   :  { %669 = vmatprep.subr.mxu1 %v1229_v8 }
 0x17a   :  { %670 = vmatpush2.msra.mxu1 %v1232_v9 }
 0x17b   :  { %671 = vmatprep.subr.mxu1 %v1235_v10 }
 0x17c   :  { %672 = vmatpush2.msra.mxu1 %v1238_v11 }
 0x205   :  { %v397_v15 = vpop.f32.mrf.mxu1 }
 0x206   :  { %v398_v16 = vadd.f32 %v397_v15, %v324_v13 }
 0x207   :  { %v399_v17 = vpop.f32.mrf.mxu1 }
 0x208   :  { %v400_v27 = vadd.f32 %v399_v17, %v328_v14  ;;  %v402_v7 = vmax.f32 %v398_v16, 0.0 }
 0x20a   :  { %v403_v8 = vmax.f32 %v400_v27, 0.0  ;;  %v1339_v27 = vld [vmem:[#allocation17_spill] sm:$0xff] }
 0x20c   :  { %544 = vmatprep.mubr.f32.mxu0 %v403_v8 }
 0x20d   :  { %545 = vmatmul.mubr.f32.vlgmr.msra.gmra.mxu0 %v402_v7 }
 0x20e   :  { %691 = vmatpush1.msra.mxu0 %v1078_v18  ;;  %v1340_v18 = vld [vmem:[#allocation18_spill] sm:$0xff] }
 0x20f   :  { %692 = vmatprep.subr.mxu0 %v1080_v19  ;;  %v592_v19 = vld [vmem:[#allocation10 + $0x138] sm:$0xff] }
 0x210   :  { %693 = vmatpush1.msra.mxu0 %v1082_v20  ;;  %673 = vmatprep.subr.mxu1 %v592_v19  ;;  %v591_v20 = vld [vmem:[#allocation10 + $0x130] sm:$0xff] }
 0x211   :  { %694 = vmatprep.subr.mxu0 %v1085_v21  ;;  %674 = vmatpush2.msra.mxu1 %v591_v20  ;;  %v590_v21 = vld [vmem:[#allocation10 + $0x128] sm:$0xff] }
 0x212   :  { %695 = vmatpush1.msra.mxu0 %v1088_v22  ;;  %675 = vmatprep.subr.mxu1 %v590_v21  ;;  %v589_v22 = vld [vmem:[#allocation10 + $0x120] sm:$0xff] }
 0x213   :  { %696 = vmatprep.subr.mxu0 %v1091_v23  ;;  %676 = vmatpush2.msra.mxu1 %v589_v22  ;;  %v588_v23 = vld [vmem:[#allocation10 + $0x118] sm:$0xff] }
 0x214   :  { %697 = vmatpush1.msra.mxu0 %v1094_v25  ;;  %677 = vmatprep.subr.mxu1 %v588_v23  ;;  %v587_v25 = vld [vmem:[#allocation10 + $0x110] sm:$0xff] }
 0x215   :  { %698 = vmatprep.subr.mxu0 %v1097_v26  ;;  %678 = vmatpush2.msra.mxu1 %v587_v25  ;;  %v586_v26 = vld [vmem:[#allocation10 + $0x108] sm:$0xff] }
 0x216   :  { %699 = vmatpush1.msra.mxu0 %v1100_v28  ;;  %v585_v28 = vld [vmem:[#allocation10 + $0x100] sm:$0xff]  ;;  %679 = vmatprep.subr.mxu1 %v586_v26 }
 0x217   :  { %700 = vmatprep.subr.mxu0 %v1103_v29  ;;  %680 = vmatpush2.msra.mxu1 %v585_v28  ;;  %v468_v29 = vld [vmem:[%s1328_s6] sm:$0x3] }
 0x218   :  { %701 = vmatpush1.msra.mxu0 %v1106_v30  ;;  %v473_v30 = vrot.slane %v468_v29, %v1069_v62 }
 0x219   :  { %702 = vmatprep.subr.mxu0 %v1109_v31  ;;  %v477_v31 = vrot.slane %v468_v29, %v1074_v0 }
 0x21a   :  { %703 = vmatpush1.msra.mxu0 %v1112_v32 }
 0x21b   :  { %704 = vmatprep.subr.mxu0 %v1115_v33 }
 0x21c   :  { %705 = vmatpush1.msra.mxu0 %v1118_v34 }
 0x21d   :  { %706 = vmatprep.subr.mxu0 %v1121_v35 }
 0x21e   :  { %707 = vmatpush1.msra.mxu0 %v1124_v36  ;;  %v842_v36 = vld [vmem:[#allocation2] sm:$0x77] }
 0x21f   :  { %708 = vmatprep.subr.mxu0 %v1127_v37 }
 0x220   :  { %709 = vmatpush1.msra.mxu0 %v1130_v38  ;;  %v1341_v38 = vld [vmem:[#allocation16_spill] sm:$0xff] }
 0x221   :  { %710 = vmatprep.subr.mxu0 %v1133_v39 }
 0x222   :  { %711 = vmatpush1.msra.mxu0 %v1136_v40 }
 0x223   :  { %712 = vmatprep.subr.mxu0 %v1139_v41 }
 0x224   :  { %713 = vmatpush1.msra.mxu0 %v1142_v42 }
 0x225   :  { %714 = vmatprep.subr.mxu0 %v1145_v43 }
 0x226   :  { %715 = vmatpush1.msra.mxu0 %v1148_v44 }
 0x227   :  { %716 = vmatprep.subr.mxu0 %v1151_v45 }
 0x228   :  { %717 = vmatpush1.msra.mxu0 %v1154_v46 }
 0x229   :  { %718 = vmatprep.subr.mxu0 %v1157_v47 }
 0x22a   :  { %719 = vmatpush1.msra.mxu0 %v1160_v48 }
 0x22b   :  { %720 = vmatprep.subr.mxu0 %v1163_v49 }
 0x22c   :  { %721 = vmatpush1.msra.mxu0 %v1166_v50 }
 0x22d   :  { %722 = vmatprep.subr.mxu0 %v1169_v51 }
 0x22e   :  { %723 = vmatpush2.msra.mxu0 %v1172_v52 }
 0x22f   :  { %724 = vmatprep.subr.mxu0 %v1175_v53 }
 0x230   :  { %725 = vmatpush2.msra.mxu0 %v1178_v54 }
 0x231   :  { %726 = vmatprep.subr.mxu0 %v1181_v55 }
 0x232   :  { %727 = vmatpush2.msra.mxu0 %v1184_v56 }
 0x233   :  { %728 = vmatprep.subr.mxu0 %v1187_v57 }
 0x234   :  { %729 = vmatpush2.msra.mxu0 %v1190_v24  ;;  %v779_v24 = vld [vmem:[%s1329_s7] sm:$0x3]  ;;  %s978_s7 = smov [#allocation11]  }
 0x235   :  { %730 = vmatprep.subr.mxu0 %v1193_v58  ;;  %s818_s22 = sshll.u32 %s978_s7, 4  ;;  %s819_s22 = int_to_ptr.vmem [resolvable:$true] %s818_s22 }
 0x236   :  { %731 = vmatpush2.msra.mxu0 %v1196_v59  ;;  %v784_v59 = vrot.slane %v779_v24, %v1069_v62  ;;  %p948_p12 = scmp.lt.s32.totalorder %s819_s22, %s819_s22 }
 0x237   :  { %732 = vmatprep.subr.mxu0 %v1199_v60 }
 0x238   :  { %733 = vmatpush2.msra.mxu0 %v1202_v61  ;;  %v793_v61 = vld [vmem:[%s1330_s8] sm:$0x3]  ;;  %s943_s8 = scalar_lea.vmem %s819_s22, 128 }
 0x239   :  { %734 = vmatprep.subr.mxu0 %v1205_v63  ;;  %v802_v7 = vrot.slane %v793_v61, %v1074_v0  ;;  %p944_p11 = scmp.ne.s32.totalorder %s819_s22, %s943_s8  ;;  %p949_p13 = scmp.lt.s32.totalorder %s943_s8, %s943_s8 }
 0x23a   :  { %735 = vmatpush2.msra.mxu0 %v1208_v1 }
 0x23b   :  { %736 = vmatprep.subr.mxu0 %v1211_v2  ;;  %v788_v2 = vrot.slane %v779_v24, %v1074_v0  ;;  %p950_p0 = por %p949_p13, %p948_p12 }
 0x23c   :  { %737 = vmatpush2.msra.mxu0 %v1214_v3 }
 0x23d   :  { %738 = vmatprep.subr.mxu0 %v1217_v4  ;;  %p951_p1 = pnand %p950_p0, %p944_p11 }
 0x23e   :  { %739 = vmatpush2.msra.mxu0 %v1220_v5 }
 0x23f   :  { %740 = vmatprep.subr.mxu0 %v1223_v6  ;;  %v798_v6 = vrot.slane %v793_v61, %v1069_v62 }
 0x240   :  { %741 = vmatpush2.msra.mxu0 %v1339_v27 }
 0x241   :  { %742 = vmatprep.subr.mxu0 %v1340_v18 }
 0x242   :  { %743 = vmatpush2.msra.mxu0 %v1232_v9 }
 0x243   :  { %744 = vmatprep.subr.mxu0 %v1235_v10 }
 0x244   :  { %745 = vmatpush2.msra.mxu0 %v1238_v11 }
 0x245   :  { %746 = vmatprep.subr.mxu0 %v592_v19 }
 0x246   :  { %747 = vmatpush2.msra.mxu0 %v591_v20 }
 0x247   :  { %748 = vmatprep.subr.mxu0 %v590_v21 }
 0x248   :  { %749 = vmatpush2.msra.mxu0 %v589_v22 }
 0x249   :  { %750 = vmatprep.subr.mxu0 %v588_v23 }
 0x24a   :  { %751 = vmatpush2.msra.mxu0 %v587_v25 }
 0x24b   :  { %752 = vmatprep.subr.mxu0 %v586_v26 }
 0x24c   :  { %753 = vmatpush2.msra.mxu0 %v585_v28 }
 0x2cd   :  { %v546_v32 = vpop.f32.mrf.mxu0 }
 0x2ce   :  { %v547_v33 = vadd.f32 %v546_v32, %v473_v30 }
 0x2cf   :  { %v548_v34 = vpop.f32.mrf.mxu0 }
 0x2d0   :  { %v549_v35 = vadd.f32 %v548_v34, %v477_v31  ;;  %v551_v37 = vadd.f32 %v842_v36, %v547_v33 }
 0x2d2   :  { %v552_v39 = vadd.f32 %v549_v35, %v1341_v38  ;;  %v688_v41 = vmul.f32 %v551_v37, %v551_v37 }
 0x2d4   :  { %681 = vmatprep.mubr.f32.mxu1 %v552_v39  ;;  %v689_v40 = vmul.f32 %v552_v39, %v552_v39 }
 0x2d5   :  { %682 = vmatmul.mubr.f32.vlgmr.msra.gmra.mxu1 %v551_v37 }
 0x2d6   :  { %754 = vmatprep.mubr.f32.mxu0 %v689_v40 }
 0x2d7   :  { %755 = vmatmul.mubr.f32.vlgmr.msra.gmra.mxu0 %v688_v41 }
 0x395   :  { %v683_v42 = vpop.f32.mrf.mxu1 }
 0x396   :  { %v761_v43 = vmul.f32 0.03125, %v683_v42 }
 0x397   :  { %v685_v44 = vpop.f32.mrf.mxu1  ;;  %v756_v45 = vpop.f32.mrf.mxu0 }
 0x398   :  { %v765_v46 = vmul.f32 %v761_v43, %v761_v43  ;;  %v762_v47 = vmul.f32 0.03125, %v685_v44  ;;  %v763_v48 = vmul.f32 0.03125, %v756_v45  ;;  %v771_v58 = vsub.f32 %v551_v37, %v761_v43 }
 0x399   :  { %v758_v49 = vpop.f32.mrf.mxu0 }
 0x39a   :  { %v766_v50 = vmul.f32 %v762_v47, %v762_v47  ;;  %v767_v51 = vsub.f32 %v763_v48, %v765_v46  ;;  %v764_v52 = vmul.f32 0.03125, %v758_v49  ;;  %v772_v63 = vsub.f32 %v552_v39, %v762_v47 }
 0x39c   :  { %v769_v53 = vmax.f32 %v767_v51, 0.0  ;;  %v768_v54 = vsub.f32 %v764_v52, %v766_v50 }
 0x39e   :  { %v773_v55 = vadd.f32 1e-05, %v769_v53  ;;  %v770_v56 = vmax.f32 %v768_v54, 0.0 }
 0x3a0   :  { %838 = vrsqrt.f32 %v773_v55  ;;  %v774_v57 = vadd.f32 1e-05, %v770_v56 }
 0x3a2   :  { %840 = vrsqrt.f32 %v774_v57 }
 0x3ad   :  { %v839_v60 = vpop.eup %838 }
 0x3ae   :  { %v777_v1 = vmul.f32 %v839_v60, %v771_v58 }
 0x3af   :  { %v841_v3 = vpop.eup %840 }
 0x3b0   :  { %v778_v4 = vmul.f32 %v841_v3, %v772_v63  ;;  %v791_v5 = vmul.f32 %v784_v59, %v777_v1 }
 0x3b2   :  { %v792_v8 = vmul.f32 %v788_v2, %v778_v4  ;;  %v805_v9 = vadd.f32 %v798_v6, %v791_v5 }
 0x3b4   :  { %v806_v10 = vadd.f32 %v802_v7, %v792_v8 }
 0x3b6   :  { %v809_v11 = vcombine.low %v805_v9, %v806_v10 }
 0x3b8   :  { %811 = vst [vmem:[#allocation11] sm:$0x77] %v809_v11 }
 0x3b9   :  { %954 = shalt.err (!%p951_p1)
}
 0x3ba   :  { %821 = dma.vmem_to_hbm [thread:$0]  %s819_s22, 128, %s1332_s10, [#allocation4]  }
 0x3bb   :  { %969 = dma.done.wait [#allocation4], 128  }
 0x3bc   :  { %970 = vsyncadd [#allocation4], 4294967168 }
 0x3bd   :  { %825 = vsyncpa [#allocation3], 1 }
 0x3be   :  { %826 = vsyncpa [#allocation6], 1 }
 0x3bf   :  { %827 = vsyncpa [#allocation9], 1 }
 0x3c0   :  { %828 = vsyncpa [#allocation4], 1 }

</bundles_post_ra>
